<compile_context>
chip_gen: v6e
topology: v6e:2x2x1
jax: 0.10.0
libtpu: 0.0.40
codegen_flags: <defaults>
</compile_context>

<pallas_src>
import math
import functools

import jax
import jax.numpy as jnp
from jax import lax
from jax.experimental import pallas as pl
from jax.experimental.pallas import tpu as pltpu


def make_pe_table(d_model: int, max_len: int = 5000, dtype=jnp.float32) -> jnp.ndarray:
    """Deterministic sinusoidal table, identical to the torch __init__."""
    position = jnp.arange(max_len, dtype=jnp.float32)[:, None]                 # (L, 1)
    div_term = jnp.exp(
        jnp.arange(0, d_model, 2, dtype=jnp.float32)
        * (-math.log(10000.0) / d_model)
    )                                                                          # (D/2,)
    pe = jnp.zeros((max_len, d_model), dtype=jnp.float32)
    pe = pe.at[:, 0::2].set(jnp.sin(position * div_term))
    pe = pe.at[:, 1::2].set(jnp.cos(position * div_term))
    return pe.astype(dtype)                                                    # (L, D)


def _pe_add_dropout_kernel(seed_ref, x_ref, pe_ref, o_ref, *,
                           p, training, threshold, total_rows, lanes):
    # x_ref / o_ref: (TB, TR, lanes)   pe_ref: (TR, lanes) — PE broadcast over batch.
    y = x_ref[...] + pe_ref[...][None, :, :]
    if training and p > 0.0:
        # Inverted dropout.  Keep mask comes from a counter-based hash of the
        # global element index mixed with the seed (murmur3 fmix32): pure
        # integer VPU ops, no stateful PRNG, mask independent of tiling.
        # TODO(synk): mask bitstream differs from torch's RNG; Bernoulli(1-p)
        # keep + 1/(1-p) rescale semantics are identical.
        tb, tr = x_ref.shape[0], x_ref.shape[1]
        b0 = pl.program_id(1) * tb
        r0 = pl.program_id(0) * tr
        shape = y.shape
        bi = lax.broadcasted_iota(jnp.int32, shape, 0) + b0
        ri = lax.broadcasted_iota(jnp.int32, shape, 1) + r0
        ci = lax.broadcasted_iota(jnp.int32, shape, 2)
        idx = (bi * total_rows + ri) * lanes + ci                  # int32, wraps OK
        idx = idx + seed_ref[0] * jnp.int32(-1640531527)           # 0x9E3779B9 seed mix
        h = lax.bitcast_convert_type(idx, jnp.uint32)
        h = h ^ (h >> 16)
        h = h * jnp.uint32(0x85EBCA6B)
        h = h ^ (h >> 13)
        h = h * jnp.uint32(0xC2B2AE35)
        h = h ^ (h >> 16)
        keep = (h >> 8) < jnp.uint32(threshold)                    # top-24-bit keep test
        scale = jnp.asarray(1.0 / (1.0 - p), dtype=y.dtype)
        y = jnp.where(keep, y * scale, jnp.zeros_like(y))
    o_ref[...] = y


@functools.lru_cache(maxsize=1)
def _vmem_limit_and_budget():
    """Scoped-VMEM limit and pipelined-footprint budget, per chip generation."""
    cap = 64 << 20                      # conservative default (v7x physical VMEM)
    try:
        cap = int(pltpu.get_tpu_info().vmem_capacity_bytes)
    except Exception:
        pass
    limit = max(32 << 20, min(cap - (8 << 20), 96 << 20))   # 56 MiB on v7x, 96 MiB on v5e/v6e
    budget = max(16 << 20, limit - (8 << 20))
    return limit, budget


def _choose_tiles(B, R, lanes, itemsize, budget, row_tile=None, batch_tile=None):
    """Pick (TB, TR) so that 2*x + 2*o + 2*pe blocks fit within the VMEM budget."""
    sub = {4: 8, 2: 16, 1: 32}.get(itemsize, 8)          # dtype sublane multiple
    row_bytes = lanes * itemsize

    if batch_tile is not None:
        tb = max(1, min(int(batch_tile), B))
    else:
        tb = B
        # Shrink the batch block until the minimal (TR = sub) footprint fits.
        while tb > 1 and sub * row_bytes * (4 * tb + 2) > budget:
            tb = (tb + 1) // 2

    if row_tile is not None:
        tr = max(1, min(int(row_tile), R))
        if tr < R and tr % sub != 0:
            tr = max(sub, (tr // sub) * sub)
    else:
        tr = budget // (row_bytes * (4 * tb + 2))
        tr = max(sub, (tr // sub) * sub)
        if tr >= R:
            tr = R                                       # full extent — always legal
        else:
            # Prefer a TR that divides R exactly (no masked remainder block),
            # but never shrink below half the budget-derived tile.
            lo = max(sub, (tr // 2 // sub) * sub)
            for cand in range(tr, lo - 1, -sub):
                if R % cand == 0:
                    tr = cand
                    break
    return tb, tr


def positional_encoding_forward(x, pe, *, p=0.1, training=False, seed=0,
                                row_tile=None, batch_tile=None):
    """x: (B, S, D) -> (B, S, D).  pe: (>=S, D) sinusoidal table.

    Note: the dropout mask stream is a deterministic function of (seed, element
    index); keep-probability is quantized to 2^-24.  Not bit-identical to
    torch's RNG.
    """
    B, S, D = x.shape
    if pe.shape[0] != S:
        pe = pe[:S]
    if pe.dtype != x.dtype:
        pe = pe.astype(x.dtype)

    # Lane-dense view of the (S, D) rows: direct / fold / pad.
    if D % 128 == 0:
        mode = "direct"
        lanes, R = D, S
        x2, pe2 = x, pe
    elif (S * D) % 128 == 0:
        mode = "fold"
        lanes = 128
        R = (S * D) // 128
        x2 = x.reshape(B, R, lanes)
        pe2 = pe.reshape(R, lanes)
    else:
        # Pad D up to the next multiple of 128 → unmasked full-lane stores.
        mode = "pad"
        Dp = ((D + 127) // 128) * 128
        lanes, R = Dp, S
        x2 = jnp.pad(x, ((0, 0), (0, 0), (0, Dp - D)))
        pe2 = jnp.pad(pe, ((0, 0), (0, Dp - D)))

    itemsize = jnp.dtype(x.dtype).itemsize
    vmem_limit, budget = _vmem_limit_and_budget()
    TB, TR = _choose_tiles(B, R, lanes, itemsize, budget,
                           row_tile=row_tile, batch_tile=batch_tile)

    # Rows outer (slow), batch inner (fast): the PE block index depends only on
    # the row axis, so it is DMA'd once per row tile (not once per batch tile).
    grid = (pl.cdiv(R, TR), pl.cdiv(B, TB))
    threshold = int(round((1.0 - p) * (1 << 24)))
    kernel = functools.partial(_pe_add_dropout_kernel, p=p, training=training,
                               threshold=threshold, total_rows=R, lanes=lanes)

    out2 = pl.pallas_call(
        kernel,
        out_shape=jax.ShapeDtypeStruct((B, R, lanes), x.dtype),
        grid_spec=pltpu.PrefetchScalarGridSpec(
            num_scalar_prefetch=1,   # dropout seed lives in SMEM
            grid=grid,
            in_specs=[
                pl.BlockSpec((TB, TR, lanes), lambda r, b, seed_ref: (b, r, 0)),
                pl.BlockSpec((TR, lanes),     lambda r, b, seed_ref: (r, 0)),
            ],
            out_specs=pl.BlockSpec((TB, TR, lanes), lambda r, b, seed_ref: (b, r, 0)),
        ),
        compiler_params=pltpu.CompilerParams(
            dimension_semantics=("parallel", "parallel"),
            vmem_limit_bytes=vmem_limit),
    )(jnp.array([seed], dtype=jnp.int32), x2, pe2)

    if mode == "fold":
        return out2.reshape(B, S, D)
    if mode == "pad":
        return out2[..., :D]
    return out2


if __name__ == "__main__":
    key = jax.random.PRNGKey(0)

    # --- Test 1: small shape consistent with the module (fold path) ---------
    B, S, D = 2, 8, 32
    x = jax.random.normal(key, (B, S, D), dtype=jnp.float32)
    pe_table = make_pe_table(d_model=D, max_len=5000, dtype=x.dtype)
    ref = x + pe_table[None, :S, :]

    out = jax.block_until_ready(
        positional_encoding_forward(x, pe_table, p=0.1, training=False))
    assert out.shape == (B, S, D) and out.dtype == jnp.float32
    assert jnp.allclose(out, ref, atol=1e-6, rtol=1e-6)

    p = 0.1
    out_tr = jax.block_until_ready(
        positional_encoding_forward(x, pe_table, p=p, training=True, seed=123))
    is_zero = out_tr == 0.0
    is_scaled = jnp.abs(out_tr - ref / (1.0 - p)) < 1e-5
    assert bool(jnp.all(is_zero | is_scaled))

    # --- Test 2: D % 128 == 0 (direct path), multi-tile grid ----------------
    B2, S2, D2 = 4, 256, 256
    x2 = jax.random.normal(jax.random.PRNGKey(1), (B2, S2, D2), dtype=jnp.float32)
    pe2 = make_pe_table(D2, max_len=512, dtype=x2.dtype)
    ref2 = x2 + pe2[None, :S2, :]
    out2 = jax.block_until_ready(
        positional_encoding_forward(x2, pe2, p=0.1, training=False,
                                    row_tile=64, batch_tile=2))
    assert jnp.allclose(out2, ref2, atol=1e-6, rtol=1e-6)
    out2_tr = jax.block_until_ready(
        positional_encoding_forward(x2, pe2, p=p, training=True, seed=7,
                                    row_tile=64, batch_tile=2))
    ok2 = (out2_tr == 0.0) | (jnp.abs(out2_tr - ref2 / (1.0 - p)) < 1e-5)
    assert bool(jnp.all(ok2))

    # --- Test 3: neither D nor S*D multiple of 128 (pad path) ---------------
    B3, S3, D3 = 2, 10, 48
    x3 = jax.random.normal(jax.random.PRNGKey(2), (B3, S3, D3), dtype=jnp.float32)
    pe3 = make_pe_table(D3, max_len=64, dtype=x3.dtype)
    ref3 = x3 + pe3[None, :S3, :]
    out3 = jax.block_until_ready(
        positional_encoding_forward(x3, pe3, p=0.1, training=False))
    assert out3.shape == (B3, S3, D3)
    assert jnp.allclose(out3, ref3, atol=1e-6, rtol=1e-6)

    print("KERNEL_OK")
</pallas_src>

<mosaic_0001>
module attributes {stable_mosaic.version = 11 : i64} {
  func.func @_pe_add_dropout_kernel(%arg0: i32, %arg1: i32, %arg2: memref<1xi32, #tpu.memory_space<smem>>, %arg3: memref<2x2x128xf32, #tpu.memory_space<vmem>>, %arg4: memref<2x128xf32, #tpu.memory_space<vmem>>, %arg5: memref<2x2x128xf32, #tpu.memory_space<vmem>>) attributes {dimension_semantics = [#tpu.dimension_semantics<parallel>, #tpu.dimension_semantics<parallel>], iteration_bounds = array<i64: 1, 1>, scalar_prefetch = 1 : i64, scratch_operands = 0 : i64, tpu.core_type = #tpu.core_type<tc>, window_params = [{transform_indices = @transform_0, window_bounds = array<i64: 2, 2, 128>}, {transform_indices = @transform_1, window_bounds = array<i64: 2, 128>}, {transform_indices = @transform_2, window_bounds = array<i64: 2, 2, 128>}]} {
    %c0 = arith.constant 0 : index
    %c0_0 = arith.constant 0 : index
    %c0_1 = arith.constant 0 : index
    %0 = vector.load %arg3[%c0, %c0_0, %c0_1] : memref<2x2x128xf32, #tpu.memory_space<vmem>>, vector<2x2x128xf32>
    %c0_2 = arith.constant 0 : index
    %c0_3 = arith.constant 0 : index
    %1 = vector.load %arg4[%c0_2, %c0_3] : memref<2x128xf32, #tpu.memory_space<vmem>>, vector<2x128xf32>
    %2 = vector.shape_cast %1 : vector<2x128xf32> to vector<1x2x128xf32>
    %3 = vector.broadcast %2 : vector<1x2x128xf32> to vector<2x2x128xf32>
    %4 = arith.addf %0, %3 : vector<2x2x128xf32>
    %c0_4 = arith.constant 0 : index
    %c0_5 = arith.constant 0 : index
    %c0_6 = arith.constant 0 : index
    %5 = vector.load %arg5[%c0_4, %c0_5, %c0_6] : memref<2x2x128xf32, #tpu.memory_space<vmem>>, vector<2x2x128xf32>
    tpu.vector_store %arg5[%c0_4, %c0_5, %c0_6], %4 {strides = array<i32>} : memref<2x2x128xf32, #tpu.memory_space<vmem>>, vector<2x2x128xf32>,
    return
  }
  func.func @transform_0(%arg0: i32, %arg1: i32, %arg2: memref<1xi32, #tpu.memory_space<smem>>) -> (i32, i32, i32) {
    %c0_i32 = arith.constant 0 : i32
    %c0_i32_0 = arith.constant 0 : i32
    return %arg1, %arg0, %c0_i32 : i32, i32, i32
  }
  func.func @transform_1(%arg0: i32, %arg1: i32, %arg2: memref<1xi32, #tpu.memory_space<smem>>) -> (i32, i32) {
    %c0_i32 = arith.constant 0 : i32
    %c0_i32_0 = arith.constant 0 : i32
    return %arg0, %c0_i32 : i32, i32
  }
  func.func @transform_2(%arg0: i32, %arg1: i32, %arg2: memref<1xi32, #tpu.memory_space<smem>>) -> (i32, i32, i32) {
    %c0_i32 = arith.constant 0 : i32
    %c0_i32_0 = arith.constant 0 : i32
    return %arg1, %arg0, %c0_i32 : i32, i32, i32
  }
}

</mosaic_0001>

<bundles_post_ra>
// kernel: tpu_custom_call.1
= control target key start
LH: loop header
LB: loop body
LE: loop exit
PB: predicated region body
PF: predicated region fallthrough
CT: control target
= control target key end

     0   :  { %9 = vsyncpa [#allocation5], 0  ;;  %s133_s0 = inlined_call_operand.<no memory space> [shape: s32[1], index: 0, kind: input, shape index: {}]   ;;  %s134_s1 = inlined_call_operand.hbm [shape: f32[2,2,128], index: 1, kind: input, shape index: {}]   ;;  %s135_s2 = inlined_call_operand.vmem [shape: f32[2,128], index: 2, kind: input, shape index: {}]   ;;  %s136_s3 = inlined_call_operand.hbm [shape: f32[2,2,128], index: 3, kind: output, shape index: {}]  }
   0x1   :  { %10 = vsyncpa [#allocation6], 0  ;;  %s100_s12 = smov [#allocation4]  }
   0x2   :  { %s16_s13 = sshll.u32 %s100_s12, 4  ;;  %s17_s13 = int_to_ptr.vmem [resolvable:$true] %s16_s13 }
   0x3   :  { %s64_s14 = scalar_lea.vmem %s17_s13, 64  ;;  %p69_p1 = scmp.lt.s32.totalorder %s17_s13, %s17_s13 }
   0x4   :  { %p65_p0 = scmp.ne.s32.totalorder %s17_s13, %s64_s14  ;;  %p70_p2 = scmp.lt.s32.totalorder %s64_s14, %s64_s14 }
   0x6   :  { %p71_p3 = por %p70_p2, %p69_p1 }
   0x8   :  { %p72_p4 = pnand %p71_p3, %p65_p0 }
   0xa   :  { %75 = shalt.err (!%p72_p4)
}
   0xb   :  { %s101_s0 = smov 32   ;;  %s102_s15 = smov 2  }
   0xc   :  { %22 = dma.hbm_to_vmem [thread:$0]  %s134_s1, 64, %s17_s13, [#allocation5], %s101_s0, %s101_s0, %s102_s15  }
   0xd   :  { %96 = dma.done.wait [#allocation5], 64  }
   0xe   :  { %97 = vsyncadd [#allocation5], 4294967232  ;;  %s103_s18 = smov [#allocation7]   ;;  %v28_v0 = vld [vmem:[#allocation4] sm:$0x3] }
   0xf   :  { %s40_s19 = sshll.u32 %s103_s18, 4  ;;  %v30_v1 = vld [vmem:[%s135_s2] sm:$0x3]  ;;  %v29_v2 = vld [vmem:[#allocation4 + $0x2] sm:$0x3]  ;;  %s41_s19 = int_to_ptr.vmem [resolvable:$true] %s40_s19 }
  0x10   :  { %v31_v3 = vadd.f32 %v30_v1, %v28_v0  ;;  %v32_v4 = vadd.f32 %v30_v1, %v29_v2  ;;  %s76_s22 = scalar_lea.vmem %s41_s19, 64  ;;  %p81_p6 = scmp.lt.s32.totalorder %s41_s19, %s41_s19 }
  0x11   :  { %p77_p5 = scmp.ne.s32.totalorder %s41_s19, %s76_s22  ;;  %p82_p7 = scmp.lt.s32.totalorder %s76_s22, %s76_s22 }
  0x12   :  { %33 = vst [vmem:[#allocation7] sm:$0x3] %v31_v3  ;;  %34 = vst [vmem:[#allocation7 + $0x2] sm:$0x3] %v32_v4 }
  0x13   :  { %p83_p8 = por %p82_p7, %p81_p6 }
  0x15   :  { %p84_p9 = pnand %p83_p8, %p77_p5 }
  0x17   :  { %87 = shalt.err (!%p84_p9)
}
  0x18   :  { %46 = dma.vmem_to_hbm [thread:$0]  %s41_s19, 64, %s136_s3, [#allocation6], %s101_s0, %s101_s0, %s102_s15  }
  0x19   :  { %98 = dma.done.wait [#allocation6], 64  }
  0x1a   :  { %99 = vsyncadd [#allocation6], 4294967232 }
  0x1b   :  { %50 = vsyncpa [#allocation5], 1 }
  0x1c   :  { %51 = vsyncpa [#allocation6], 1 }

</bundles_post_ra>
